<compile_context>
chip_gen: v6e
topology: v6e:2x2x1
jax: 0.10.0
libtpu: 0.0.40
codegen_flags: <defaults>
</compile_context>

<pallas_src>
import functools

import jax
import jax.numpy as jnp
from jax.experimental import pallas as pl
from jax.experimental.pallas import tpu as pltpu


def _round_up(x, m):
    return ((x + m - 1) // m) * m


_VMEM_CAP = None


def _physical_vmem_bytes():
    """Per-core VMEM capacity; conservative fallback (v7x: 64 MiB) if unqueryable."""
    global _VMEM_CAP
    if _VMEM_CAP is None:
        try:
            cap = int(pltpu.get_tpu_info().vmem_capacity_bytes)
            _VMEM_CAP = cap if cap > 0 else (64 << 20)
        except Exception:
            _VMEM_CAP = 64 << 20
    return _VMEM_CAP


def _make_fused_mlp_kernel(num_layers_total, final_tanh):
    """Kernel signature: x_ref, w0, b0, w1, b1, ..., o_ref. Whole MLP in one body."""

    def kernel(x_ref, *refs):
        o_ref = refs[-1]
        wb = refs[:-1]
        h = x_ref[...]                                  # f32 activations
        for i in range(num_layers_total):
            w = wb[2 * i][...]                          # bf16 weights (MXU-native)
            b = wb[2 * i + 1][...]                      # f32 (1, out_pad) bias
            # bf16 MXU operands, f32 accumulation.
            y = jnp.dot(h.astype(jnp.bfloat16), w,
                        preferred_element_type=jnp.float32) + b
            if i < num_layers_total - 1:
                # LipSwish = 0.909 * silu; the 0.909 is folded into the next layer's
                # weights, so only plain silu remains (sigmoid runs on the EUP slot).
                # TODO(synk): on v6e/v7x a bf16 sigmoid/tanh would relieve the single
                # transcendental slot for narrow hiddens; kept f32 so the same kernel
                # also runs on v5e (no bf16 VPU/EUP).
                h = y * jax.nn.sigmoid(y)
            else:
                h = jnp.tanh(y) if final_tanh else y
        o_ref[...] = h.astype(o_ref.dtype)

    return kernel


def init_mlp_params(key, in_size, out_size, mlp_size, num_layers):
    """Deterministic init mirroring nn.Linear defaults (uniform +/- 1/sqrt(fan_in)).
    Returns list of (W, b) with W already transposed to (in, out)."""
    sizes = [(in_size, mlp_size)]
    for _ in range(num_layers - 1):
        sizes.append((mlp_size, mlp_size))
    sizes.append((mlp_size, out_size))

    params = []
    for (fan_in, fan_out) in sizes:
        key, kw, kb = jax.random.split(key, 3)
        bound = 1.0 / jnp.sqrt(fan_in)
        w = jax.random.uniform(kw, (fan_in, fan_out), jnp.float32, -bound, bound)
        b = jax.random.uniform(kb, (fan_out,), jnp.float32, -bound, bound)
        params.append((w, b))
    return params


def _pad_and_fold_params(params):
    """Zero-pad fan_out (and fan_in for layers > 0) to 128-multiples; fold the 0.909
    LipSwish scale into every layer after the first (each such layer consumes a LipSwish
    output so the scale commutes into its weights); pre-cast weights to bf16 so HBM->VMEM
    DMA and VMEM residency are halved and no per-layer cast is needed in the kernel."""
    padded = []
    for i, (w, b) in enumerate(params):
        fan_in, fan_out = w.shape
        in_p = fan_in if i == 0 else _round_up(fan_in, 128)   # layer 0: true fan_in
        out_p = _round_up(fan_out, 128)
        w_eff = w * jnp.float32(0.909) if i > 0 else w
        w_pad = jnp.zeros((in_p, out_p), jnp.float32).at[:fan_in, :fan_out].set(w_eff)
        b_pad = jnp.zeros((1, out_p), jnp.float32).at[0, :fan_out].set(b)
        padded.append((w_pad.astype(jnp.bfloat16), b_pad))
    return padded


@functools.partial(jax.jit,
                   static_argnames=("tanh", "batch_tile", "single_buffer_weights"))
def _mlp_forward_impl(x, params, tanh, batch_tile, single_buffer_weights):
    B, in_size = x.shape
    out_size = params[-1][0].shape[1]

    padded = _pad_and_fold_params(params)
    out_p = padded[-1][0].shape[1]
    max_pad = max(w.shape[1] for (w, _) in padded)
    n_layers = len(padded)

    # Batch tiling: >= 8 sublanes; prefer >= 2 grid steps so the "parallel" batch axis
    # can shard across both TensorCores on v7x; large default tile amortizes per-step
    # overhead on v5e/v6e.
    bt_cap = _round_up(max(batch_tile, 8), 8)
    if B > 8:
        bt = min(bt_cap, _round_up(pl.cdiv(B, 2), 8))
    else:
        bt = _round_up(B, 8)
    bt = max(bt, 8)
    b_pad = _round_up(B, bt)

    # Only the batch dim is padded (no 128-lane-padded x materialized in HBM).
    x_in = x if b_pad == B else jnp.zeros((b_pad, in_size), x.dtype).at[:B].set(x)

    kernel = _make_fused_mlp_kernel(n_layers, tanh)

    wb_kwargs = {}
    if single_buffer_weights:
        # Constant index_map -> no prefetch-ahead needed; one buffer halves resident VMEM.
        wb_kwargs = dict(pipeline_mode=pl.Buffered(1))

    in_specs = [pl.BlockSpec((bt, in_size), lambda i: (i, 0))]
    flat_args = []
    for (w, b) in padded:
        in_specs.append(pl.BlockSpec(w.shape, lambda i: (0, 0), **wb_kwargs))
        in_specs.append(pl.BlockSpec(b.shape, lambda i: (0, 0), **wb_kwargs))
        flat_args.append(w)
        flat_args.append(b)

    # Honest VMEM budget: buffered weights/biases + double-buffered activation I/O tiles
    # + live unrolled intermediates + compiler-internal scratch, clamped below physical
    # per-core VMEM with 8 MiB headroom (v7x physical is only 64 MiB).
    wb_bufs = 1 if single_buffer_weights else 2
    weight_bytes = wb_bufs * sum(
        w.size * w.dtype.itemsize + b.size * b.dtype.itemsize for (w, b) in padded)
    act_io_bytes = 2 * bt * in_size * 4 + 2 * bt * out_p * 4
    live_bytes = (n_layers + 1) * bt * max_pad * 4
    need = weight_bytes + act_io_bytes + live_bytes + (2 << 20)
    physical = _physical_vmem_bytes()
    vmem_limit = int(min(max(need, 16 << 20), physical - (8 << 20)))

    # TODO(synk): when bf16 weight residency exceeds ~half the per-gen VMEM budget
    # (large mlp_size / num_layers), switch to streaming weights per layer with
    # pltpu.emit_pipeline instead of keeping every layer resident.

    out = pl.pallas_call(
        kernel,
        out_shape=jax.ShapeDtypeStruct((b_pad, out_p), jnp.float32),
        grid=(b_pad // bt,),
        in_specs=in_specs,
        out_specs=pl.BlockSpec((bt, out_p), lambda i: (i, 0)),
        compiler_params=pltpu.CompilerParams(
            dimension_semantics=("parallel",),
            vmem_limit_bytes=vmem_limit,
        ),
    )(x_in, *flat_args)

    return out[:B, :out_size]


def mlp_forward(x, params, tanh, batch_tile=512):
    """Forward pass of the full MLP as a single fused Pallas kernel.
    x: (B, in_size) f32; params: list of (W (in,out), b (out,)) f32 (unpadded)."""
    try:
        return _mlp_forward_impl(x, params, tanh=tanh, batch_tile=batch_tile,
                                 single_buffer_weights=True)
    except Exception:
        # Fallback: default double-buffered weight specs (older jax without pipeline_mode).
        return _mlp_forward_impl(x, params, tanh=tanh, batch_tile=batch_tile,
                                 single_buffer_weights=False)


def mlp_reference(x, params, tanh):
    """Pure-JAX f32 reference (original, unpadded, unscaled params)."""
    h = x
    n = len(params)
    for i, (w, b) in enumerate(params):
        h = h @ w + b
        if i < n - 1:
            h = 0.909 * h * jax.nn.sigmoid(h)
        elif tanh:
            h = jnp.tanh(h)
    return h


if __name__ == "__main__":
    # Small shapes consistent with the module's forward.
    batch = 8
    in_size = 4
    out_size = 4
    mlp_size = 32
    num_layers = 3
    use_tanh = True

    key = jax.random.PRNGKey(0)
    key, kx = jax.random.split(key)
    x = jax.random.normal(kx, (batch, in_size), jnp.float32)

    params = init_mlp_params(key, in_size, out_size, mlp_size, num_layers)

    out = mlp_forward(x, params, use_tanh)
    out = jax.block_until_ready(out)

    ref = mlp_reference(x, params, use_tanh)
    assert out.shape == (batch, out_size), f"bad shape {out.shape}"
    # bf16 MXU operands (f32 accumulation) -> tolerance relaxed vs the pure-f32 reference.
    assert jnp.allclose(out, ref, atol=2e-2, rtol=2e-2), (
        f"mismatch vs reference, max abs diff {jnp.max(jnp.abs(out - ref))}")

    print("KERNEL_OK")
</pallas_src>

<mosaic_0001>
module attributes {stable_mosaic.version = 11 : i64} {
  func.func @kernel(%arg0: i32, %arg1: memref<8x4xf32, #tpu.memory_space<vmem>>, %arg2: memref<4x128xbf16, #tpu.memory_space<vmem>>, %arg3: memref<1x128xf32, #tpu.memory_space<vmem>>, %arg4: memref<128x128xbf16, #tpu.memory_space<vmem>>, %arg5: memref<1x128xf32, #tpu.memory_space<vmem>>, %arg6: memref<128x128xbf16, #tpu.memory_space<vmem>>, %arg7: memref<1x128xf32, #tpu.memory_space<vmem>>, %arg8: memref<128x128xbf16, #tpu.memory_space<vmem>>, %arg9: memref<1x128xf32, #tpu.memory_space<vmem>>, %arg10: memref<8x128xf32, #tpu.memory_space<vmem>>) attributes {dimension_semantics = [#tpu.dimension_semantics<parallel>], iteration_bounds = array<i64: 1>, scalar_prefetch = 0 : i64, scratch_operands = 0 : i64, tpu.core_type = #tpu.core_type<tc>, window_params = [{transform_indices = @transform_0, window_bounds = array<i64: 8, 4>}, {pipeline_mode = #tpu.pipeline_mode<synchronous>, transform_indices = @transform_1, window_bounds = array<i64: 4, 128>}, {pipeline_mode = #tpu.pipeline_mode<synchronous>, transform_indices = @transform_2, window_bounds = array<i64: 1, 128>}, {pipeline_mode = #tpu.pipeline_mode<synchronous>, transform_indices = @transform_3, window_bounds = array<i64: 128, 128>}, {pipeline_mode = #tpu.pipeline_mode<synchronous>, transform_indices = @transform_4, window_bounds = array<i64: 1, 128>}, {pipeline_mode = #tpu.pipeline_mode<synchronous>, transform_indices = @transform_5, window_bounds = array<i64: 128, 128>}, {pipeline_mode = #tpu.pipeline_mode<synchronous>, transform_indices = @transform_6, window_bounds = array<i64: 1, 128>}, {pipeline_mode = #tpu.pipeline_mode<synchronous>, transform_indices = @transform_7, window_bounds = array<i64: 128, 128>}, {pipeline_mode = #tpu.pipeline_mode<synchronous>, transform_indices = @transform_8, window_bounds = array<i64: 1, 128>}, {transform_indices = @transform_9, window_bounds = array<i64: 8, 128>}]} {
    %c0 = arith.constant 0 : index
    %c0_0 = arith.constant 0 : index
    %0 = vector.load %arg1[%c0, %c0_0] : memref<8x4xf32, #tpu.memory_space<vmem>>, vector<8x4xf32>
    %c0_1 = arith.constant 0 : index
    %c0_2 = arith.constant 0 : index
    %1 = vector.load %arg2[%c0_1, %c0_2] : memref<4x128xbf16, #tpu.memory_space<vmem>>, vector<4x128xbf16>
    %c0_3 = arith.constant 0 : index
    %c0_4 = arith.constant 0 : index
    %2 = vector.load %arg3[%c0_3, %c0_4] : memref<1x128xf32, #tpu.memory_space<vmem>>, vector<1x128xf32>
    %3 = arith.truncf %0 : vector<8x4xf32> to vector<8x4xbf16>
    %cst = arith.constant dense<0.000000e+00> : vector<8x128xf32>
    %4 = tpu.matmul %3, %1, %cst {dimension_numbers = #tpu.dot_dimension_numbers<[1], [0], [0], [1], [0, 0, 1, 1], [], []>} : vector<8x4xbf16>, vector<4x128xbf16>, vector<8x128xf32> -> vector<8x128xf32>
    %5 = vector.broadcast %2 : vector<1x128xf32> to vector<8x128xf32>
    %6 = arith.addf %4, %5 : vector<8x128xf32>
    %7 = arith.negf %6 : vector<8x128xf32>
    %8 = math.exp %7 : vector<8x128xf32>
    %cst_5 = arith.constant 1.000000e+00 : f32
    %9 = vector.broadcast %cst_5 : f32 to vector<8x128xf32>
    %10 = arith.addf %9, %8 : vector<8x128xf32>
    %11 = arith.divf %9, %10 : vector<8x128xf32>
    %12 = arith.mulf %6, %11 : vector<8x128xf32>
    %c0_6 = arith.constant 0 : index
    %c0_7 = arith.constant 0 : index
    %13 = vector.load %arg4[%c0_6, %c0_7] : memref<128x128xbf16, #tpu.memory_space<vmem>>, vector<128x128xbf16>
    %c0_8 = arith.constant 0 : index
    %c0_9 = arith.constant 0 : index
    %14 = vector.load %arg5[%c0_8, %c0_9] : memref<1x128xf32, #tpu.memory_space<vmem>>, vector<1x128xf32>
    %15 = arith.truncf %12 : vector<8x128xf32> to vector<8x128xbf16>
    %cst_10 = arith.constant dense<0.000000e+00> : vector<8x128xf32>
    %16 = tpu.matmul %15, %13, %cst_10 {dimension_numbers = #tpu.dot_dimension_numbers<[1], [0], [0], [1], [0, 0, 1, 1], [], []>} : vector<8x128xbf16>, vector<128x128xbf16>, vector<8x128xf32> -> vector<8x128xf32>
    %17 = vector.broadcast %14 : vector<1x128xf32> to vector<8x128xf32>
    %18 = arith.addf %16, %17 : vector<8x128xf32>
    %19 = arith.negf %18 : vector<8x128xf32>
    %20 = math.exp %19 : vector<8x128xf32>
    %cst_11 = arith.constant 1.000000e+00 : f32
    %21 = vector.broadcast %cst_11 : f32 to vector<8x128xf32>
    %22 = arith.addf %21, %20 : vector<8x128xf32>
    %23 = arith.divf %21, %22 : vector<8x128xf32>
    %24 = arith.mulf %18, %23 : vector<8x128xf32>
    %c0_12 = arith.constant 0 : index
    %c0_13 = arith.constant 0 : index
    %25 = vector.load %arg6[%c0_12, %c0_13] : memref<128x128xbf16, #tpu.memory_space<vmem>>, vector<128x128xbf16>
    %c0_14 = arith.constant 0 : index
    %c0_15 = arith.constant 0 : index
    %26 = vector.load %arg7[%c0_14, %c0_15] : memref<1x128xf32, #tpu.memory_space<vmem>>, vector<1x128xf32>
    %27 = arith.truncf %24 : vector<8x128xf32> to vector<8x128xbf16>
    %cst_16 = arith.constant dense<0.000000e+00> : vector<8x128xf32>
    %28 = tpu.matmul %27, %25, %cst_16 {dimension_numbers = #tpu.dot_dimension_numbers<[1], [0], [0], [1], [0, 0, 1, 1], [], []>} : vector<8x128xbf16>, vector<128x128xbf16>, vector<8x128xf32> -> vector<8x128xf32>
    %29 = vector.broadcast %26 : vector<1x128xf32> to vector<8x128xf32>
    %30 = arith.addf %28, %29 : vector<8x128xf32>
    %31 = arith.negf %30 : vector<8x128xf32>
    %32 = math.exp %31 : vector<8x128xf32>
    %cst_17 = arith.constant 1.000000e+00 : f32
    %33 = vector.broadcast %cst_17 : f32 to vector<8x128xf32>
    %34 = arith.addf %33, %32 : vector<8x128xf32>
    %35 = arith.divf %33, %34 : vector<8x128xf32>
    %36 = arith.mulf %30, %35 : vector<8x128xf32>
    %c0_18 = arith.constant 0 : index
    %c0_19 = arith.constant 0 : index
    %37 = vector.load %arg8[%c0_18, %c0_19] : memref<128x128xbf16, #tpu.memory_space<vmem>>, vector<128x128xbf16>
    %c0_20 = arith.constant 0 : index
    %c0_21 = arith.constant 0 : index
    %38 = vector.load %arg9[%c0_20, %c0_21] : memref<1x128xf32, #tpu.memory_space<vmem>>, vector<1x128xf32>
    %39 = arith.truncf %36 : vector<8x128xf32> to vector<8x128xbf16>
    %cst_22 = arith.constant dense<0.000000e+00> : vector<8x128xf32>
    %40 = tpu.matmul %39, %37, %cst_22 {dimension_numbers = #tpu.dot_dimension_numbers<[1], [0], [0], [1], [0, 0, 1, 1], [], []>} : vector<8x128xbf16>, vector<128x128xbf16>, vector<8x128xf32> -> vector<8x128xf32>
    %41 = vector.broadcast %38 : vector<1x128xf32> to vector<8x128xf32>
    %42 = arith.addf %40, %41 : vector<8x128xf32>
    %43 = math.tanh %42 : vector<8x128xf32>
    %c0_23 = arith.constant 0 : index
    %c0_24 = arith.constant 0 : index
    %44 = vector.load %arg10[%c0_23, %c0_24] : memref<8x128xf32, #tpu.memory_space<vmem>>, vector<8x128xf32>
    tpu.vector_store %arg10[%c0_23, %c0_24], %43 {strides = array<i32>} : memref<8x128xf32, #tpu.memory_space<vmem>>, vector<8x128xf32>,
    return
  }
  func.func @transform_0(%arg0: i32) -> (i32, i32) {
    %c0_i32 = arith.constant 0 : i32
    %c0_i32_0 = arith.constant 0 : i32
    return %arg0, %c0_i32 : i32, i32
  }
  func.func @transform_1(%arg0: i32) -> (i32, i32) {
    %c0_i32 = arith.constant 0 : i32
    %c0_i32_0 = arith.constant 0 : i32
    %c0_i32_1 = arith.constant 0 : i32
    return %c0_i32, %c0_i32_0 : i32, i32
  }
  func.func @transform_2(%arg0: i32) -> (i32, i32) {
    %c0_i32 = arith.constant 0 : i32
    %c0_i32_0 = arith.constant 0 : i32
    %c0_i32_1 = arith.constant 0 : i32
    return %c0_i32, %c0_i32_0 : i32, i32
  }
  func.func @transform_3(%arg0: i32) -> (i32, i32) {
    %c0_i32 = arith.constant 0 : i32
    %c0_i32_0 = arith.constant 0 : i32
    %c0_i32_1 = arith.constant 0 : i32
    return %c0_i32, %c0_i32_0 : i32, i32
  }
  func.func @transform_4(%arg0: i32) -> (i32, i32) {
    %c0_i32 = arith.constant 0 : i32
    %c0_i32_0 = arith.constant 0 : i32
    %c0_i32_1 = arith.constant 0 : i32
    return %c0_i32, %c0_i32_0 : i32, i32
  }
  func.func @transform_5(%arg0: i32) -> (i32, i32) {
    %c0_i32 = arith.constant 0 : i32
    %c0_i32_0 = arith.constant 0 : i32
    %c0_i32_1 = arith.constant 0 : i32
    return %c0_i32, %c0_i32_0 : i32, i32
  }
  func.func @transform_6(%arg0: i32) -> (i32, i32) {
    %c0_i32 = arith.constant 0 : i32
    %c0_i32_0 = arith.constant 0 : i32
    %c0_i32_1 = arith.constant 0 : i32
    return %c0_i32, %c0_i32_0 : i32, i32
  }
  func.func @transform_7(%arg0: i32) -> (i32, i32) {
    %c0_i32 = arith.constant 0 : i32
    %c0_i32_0 = arith.constant 0 : i32
    %c0_i32_1 = arith.constant 0 : i32
    return %c0_i32, %c0_i32_0 : i32, i32
  }
  func.func @transform_8(%arg0: i32) -> (i32, i32) {
    %c0_i32 = arith.constant 0 : i32
    %c0_i32_0 = arith.constant 0 : i32
    %c0_i32_1 = arith.constant 0 : i32
    return %c0_i32, %c0_i32_0 : i32, i32
  }
  func.func @transform_9(%arg0: i32) -> (i32, i32) {
    %c0_i32 = arith.constant 0 : i32
    %c0_i32_0 = arith.constant 0 : i32
    return %arg0, %c0_i32 : i32, i32
  }
}

module attributes {stable_mosaic.version = 11 : i64} {
  func.func @kernel(%arg0: i32, %arg1: memref<8x4xf32, #tpu.memory_space<vmem>>, %arg2: memref<4x128xbf16, #tpu.memory_space<vmem>>, %arg3: memref<1x128xf32, #tpu.memory_space<vmem>>, %arg4: memref<128x128xbf16, #tpu.memory_space<vmem>>, %arg5: memref<1x128xf32, #tpu.memory_space<vmem>>, %arg6: memref<128x128xbf16, #tpu.memory_space<vmem>>, %arg7: memref<1x128xf32, #tpu.memory_space<vmem>>, %arg8: memref<128x128xbf16, #tpu.memory_space<vmem>>, %arg9: memref<1x128xf32, #tpu.memory_space<vmem>>, %arg10: memref<8x128xf32, #tpu.memory_space<vmem>>) attributes {dimension_semantics = [#tpu.dimension_semantics<parallel>], iteration_bounds = array<i64: 1>, scalar_prefetch = 0 : i64, scratch_operands = 0 : i64, tpu.core_type = #tpu.core_type<tc>, window_params = [{transform_indices = @transform_0, window_bounds = array<i64: 8, 4>}, {pipeline_mode = #tpu.pipeline_mode<synchronous>, transform_indices = @transform_1, window_bounds = array<i64: 4, 128>}, {pipeline_mode = #tpu.pipeline_mode<synchronous>, transform_indices = @transform_2, window_bounds = array<i64: 1, 128>}, {pipeline_mode = #tpu.pipeline_mode<synchronous>, transform_indices = @transform_3, window_bounds = array<i64: 128, 128>}, {pipeline_mode = #tpu.pipeline_mode<synchronous>, transform_indices = @transform_4, window_bounds = array<i64: 1, 128>}, {pipeline_mode = #tpu.pipeline_mode<synchronous>, transform_indices = @transform_5, window_bounds = array<i64: 128, 128>}, {pipeline_mode = #tpu.pipeline_mode<synchronous>, transform_indices = @transform_6, window_bounds = array<i64: 1, 128>}, {pipeline_mode = #tpu.pipeline_mode<synchronous>, transform_indices = @transform_7, window_bounds = array<i64: 128, 128>}, {pipeline_mode = #tpu.pipeline_mode<synchronous>, transform_indices = @transform_8, window_bounds = array<i64: 1, 128>}, {transform_indices = @transform_9, window_bounds = array<i64: 8, 128>}]} {
    %c0 = arith.constant 0 : index
    %c0_0 = arith.constant 0 : index
    %0 = vector.load %arg1[%c0, %c0_0] : memref<8x4xf32, #tpu.memory_space<vmem>>, vector<8x4xf32>
    %c0_1 = arith.constant 0 : index
    %c0_2 = arith.constant 0 : index
    %1 = vector.load %arg2[%c0_1, %c0_2] : memref<4x128xbf16, #tpu.memory_space<vmem>>, vector<4x128xbf16>
    %c0_3 = arith.constant 0 : index
    %c0_4 = arith.constant 0 : index
    %2 = vector.load %arg3[%c0_3, %c0_4] : memref<1x128xf32, #tpu.memory_space<vmem>>, vector<1x128xf32>
    %3 = arith.truncf %0 : vector<8x4xf32> to vector<8x4xbf16>
    %cst = arith.constant dense<0.000000e+00> : vector<8x128xf32>
    %4 = tpu.matmul %3, %1, %cst {dimension_numbers = #tpu.dot_dimension_numbers<[1], [0], [0], [1], [0, 0, 1, 1], [], []>} : vector<8x4xbf16>, vector<4x128xbf16>, vector<8x128xf32> -> vector<8x128xf32>
    %5 = vector.broadcast %2 : vector<1x128xf32> to vector<8x128xf32>
    %6 = arith.addf %4, %5 : vector<8x128xf32>
    %7 = arith.negf %6 : vector<8x128xf32>
    %8 = math.exp %7 : vector<8x128xf32>
    %cst_5 = arith.constant 1.000000e+00 : f32
    %9 = vector.broadcast %cst_5 : f32 to vector<8x128xf32>
    %10 = arith.addf %9, %8 : vector<8x128xf32>
    %11 = arith.divf %9, %10 : vector<8x128xf32>
    %12 = arith.mulf %6, %11 : vector<8x128xf32>
    %c0_6 = arith.constant 0 : index
    %c0_7 = arith.constant 0 : index
    %13 = vector.load %arg4[%c0_6, %c0_7] : memref<128x128xbf16, #tpu.memory_space<vmem>>, vector<128x128xbf16>
    %c0_8 = arith.constant 0 : index
    %c0_9 = arith.constant 0 : index
    %14 = vector.load %arg5[%c0_8, %c0_9] : memref<1x128xf32, #tpu.memory_space<vmem>>, vector<1x128xf32>
    %15 = arith.truncf %12 : vector<8x128xf32> to vector<8x128xbf16>
    %cst_10 = arith.constant dense<0.000000e+00> : vector<8x128xf32>
    %16 = tpu.matmul %15, %13, %cst_10 {dimension_numbers = #tpu.dot_dimension_numbers<[1], [0], [0], [1], [0, 0, 1, 1], [], []>} : vector<8x128xbf16>, vector<128x128xbf16>, vector<8x128xf32> -> vector<8x128xf32>
    %17 = vector.broadcast %14 : vector<1x128xf32> to vector<8x128xf32>
    %18 = arith.addf %16, %17 : vector<8x128xf32>
    %19 = arith.negf %18 : vector<8x128xf32>
    %20 = math.exp %19 : vector<8x128xf32>
    %cst_11 = arith.constant 1.000000e+00 : f32
    %21 = vector.broadcast %cst_11 : f32 to vector<8x128xf32>
    %22 = arith.addf %21, %20 : vector<8x128xf32>
    %23 = arith.divf %21, %22 : vector<8x128xf32>
    %24 = arith.mulf %18, %23 : vector<8x128xf32>
    %c0_12 = arith.constant 0 : index
    %c0_13 = arith.constant 0 : index
    %25 = vector.load %arg6[%c0_12, %c0_13] : memref<128x128xbf16, #tpu.memory_space<vmem>>, vector<128x128xbf16>
    %c0_14 = arith.constant 0 : index
    %c0_15 = arith.constant 0 : index
    %26 = vector.load %arg7[%c0_14, %c0_15] : memref<1x128xf32, #tpu.memory_space<vmem>>, vector<1x128xf32>
    %27 = arith.truncf %24 : vector<8x128xf32> to vector<8x128xbf16>
    %cst_16 = arith.constant dense<0.000000e+00> : vector<8x128xf32>
    %28 = tpu.matmul %27, %25, %cst_16 {dimension_numbers = #tpu.dot_dimension_numbers<[1], [0], [0], [1], [0, 0, 1, 1], [], []>} : vector<8x128xbf16>, vector<128x128xbf16>, vector<8x128xf32> -> vector<8x128xf32>
    %29 = vector.broadcast %26 : vector<1x128xf32> to vector<8x128xf32>
    %30 = arith.addf %28, %29 : vector<8x128xf32>
    %31 = arith.negf %30 : vector<8x128xf32>
    %32 = math.exp %31 : vector<8x128xf32>
    %cst_17 = arith.constant 1.000000e+00 : f32
    %33 = vector.broadcast %cst_17 : f32 to vector<8x128xf32>
    %34 = arith.addf %33, %32 : vector<8x128xf32>
    %35 = arith.divf %33, %34 : vector<8x128xf32>
    %36 = arith.mulf %30, %35 : vector<8x128xf32>
    %c0_18 = arith.constant 0 : index
    %c0_19 = arith.constant 0 : index
    %37 = vector.load %arg8[%c0_18, %c0_19] : memref<128x128xbf16, #tpu.memory_space<vmem>>, vector<128x128xbf16>
    %c0_20 = arith.constant 0 : index
    %c0_21 = arith.constant 0 : index
    %38 = vector.load %arg9[%c0_20, %c0_21] : memref<1x128xf32, #tpu.memory_space<vmem>>, vector<1x128xf32>
    %39 = arith.truncf %36 : vector<8x128xf32> to vector<8x128xbf16>
    %cst_22 = arith.constant dense<0.000000e+00> : vector<8x128xf32>
    %40 = tpu.matmul %39, %37, %cst_22 {dimension_numbers = #tpu.dot_dimension_numbers<[1], [0], [0], [1], [0, 0, 1, 1], [], []>} : vector<8x128xbf16>, vector<128x128xbf16>, vector<8x128xf32> -> vector<8x128xf32>
    %41 = vector.broadcast %38 : vector<1x128xf32> to vector<8x128xf32>
    %42 = arith.addf %40, %41 : vector<8x128xf32>
    %43 = math.tanh %42 : vector<8x128xf32>
    %c0_23 = arith.constant 0 : index
    %c0_24 = arith.constant 0 : index
    %44 = vector.load %arg10[%c0_23, %c0_24] : memref<8x128xf32, #tpu.memory_space<vmem>>, vector<8x128xf32>
    tpu.vector_store %arg10[%c0_23, %c0_24], %43 {strides = array<i32>} : memref<8x128xf32, #tpu.memory_space<vmem>>, vector<8x128xf32>,
    return
  }
  func.func @transform_0(%arg0: i32) -> (i32, i32) {
    %c0_i32 = arith.constant 0 : i32
    %c0_i32_0 = arith.constant 0 : i32
    return %arg0, %c0_i32 : i32, i32
  }
  func.func @transform_1(%arg0: i32) -> (i32, i32) {
    %c0_i32 = arith.constant 0 : i32
    %c0_i32_0 = arith.constant 0 : i32
    %c0_i32_1 = arith.constant 0 : i32
    return %c0_i32, %c0_i32_0 : i32, i32
  }
  func.func @transform_2(%arg0: i32) -> (i32, i32) {
    %c0_i32 = arith.constant 0 : i32
    %c0_i32_0 = arith.constant 0 : i32
    %c0_i32_1 = arith.constant 0 : i32
    return %c0_i32, %c0_i32_0 : i32, i32
  }
  func.func @transform_3(%arg0: i32) -> (i32, i32) {
    %c0_i32 = arith.constant 0 : i32
    %c0_i32_0 = arith.constant 0 : i32
    %c0_i32_1 = arith.constant 0 : i32
    return %c0_i32, %c0_i32_0 : i32, i32
  }
  func.func @transform_4(%arg0: i32) -> (i32, i32) {
    %c0_i32 = arith.constant 0 : i32
    %c0_i32_0 = arith.constant 0 : i32
    %c0_i32_1 = arith.constant 0 : i32
    return %c0_i32, %c0_i32_0 : i32, i32
  }
  func.func @transform_5(%arg0: i32) -> (i32, i32) {
    %c0_i32 = arith.constant 0 : i32
    %c0_i32_0 = arith.constant 0 : i32
    %c0_i32_1 = arith.constant 0 : i32
    return %c0_i32, %c0_i32_0 : i32, i32
  }
  func.func @transform_6(%arg0: i32) -> (i32, i32) {
    %c0_i32 = arith.constant 0 : i32
    %c0_i32_0 = arith.constant 0 : i32
    %c0_i32_1 = arith.constant 0 : i32
    return %c0_i32, %c0_i32_0 : i32, i32
  }
  func.func @transform_7(%arg0: i32) -> (i32, i32) {
    %c0_i32 = arith.constant 0 : i32
    %c0_i32_0 = arith.constant 0 : i32
    %c0_i32_1 = arith.constant 0 : i32
    return %c0_i32, %c0_i32_0 : i32, i32
  }
  func.func @transform_8(%arg0: i32) -> (i32, i32) {
    %c0_i32 = arith.constant 0 : i32
    %c0_i32_0 = arith.constant 0 : i32
    %c0_i32_1 = arith.constant 0 : i32
    return %c0_i32, %c0_i32_0 : i32, i32
  }
  func.func @transform_9(%arg0: i32) -> (i32, i32) {
    %c0_i32 = arith.constant 0 : i32
    %c0_i32_0 = arith.constant 0 : i32
    return %arg0, %c0_i32 : i32, i32
  }
}

</mosaic_0001>

<bundles_post_ra>
// kernel: _mlp_forward_impl.1
= control target key start
LH: loop header
LB: loop body
LE: loop exit
PB: predicated region body
PF: predicated region fallthrough
CT: control target
= control target key end

     0   :  { %vm47_vm0 = vcmask 1041408   ;;  %v621_v0 = vmov 0.0   ;;  %vm622_vm1 = vmmov 0   ;;  %vm43_vm2 = vcmask 31744   ;;  %s799_s1 = inlined_call_operand.vmem [shape: bf16[4,128], index: 1, kind: input, shape index: {}]   ;;  %s800_s0 = inlined_call_operand.vmem [shape: f32[8,4], index: 0, kind: input, shape index: {}]   ;;  %s801_s3 = inlined_call_operand.vmem [shape: bf16[128,128], index: 3, kind: input, shape index: {}]   ;;  %s802_s2 = inlined_call_operand.vmem [shape: f32[1,128], index: 2, kind: input, shape index: {}]   ;;  %s803_s5 = inlined_call_operand.vmem [shape: bf16[128,128], index: 5, kind: input, shape index: {}]   ;;  %s804_s4 = inlined_call_operand.vmem [shape: f32[1,128], index: 4, kind: input, shape index: {}]   ;;  %s805_s7 = inlined_call_operand.vmem [shape: bf16[128,128], index: 7, kind: input, shape index: {}]   ;;  %s806_s6 = inlined_call_operand.vmem [shape: f32[1,128], index: 6, kind: input, shape index: {}]   ;;  %s807_s8 = inlined_call_operand.vmem [shape: f32[1,128], index: 8, kind: input, shape index: {}]   ;;  %s808_s9 = inlined_call_operand.vmem [shape: f32[8,128], index: 9, kind: output, shape index: {}]  }
   0x1   :  { %515 = vmatprep.subr.bf16.mxu0 %v621_v0  ;;  %v34_v1 = vld [vmem:[%s799_s1] sm:$0x3]  ;;  %517 = vmatprep.mubr.msk.bf16.mxu0 %vm622_vm1, %v621_v0  ;;  %v583_v5 = vld [vmem:[%s801_s3 + $0x38] sm:$0xff]   ;;  %v584_v6 = vld [vmem:[%s801_s3 + $0x30] sm:$0xff]  }
   0x2   :  { %v33_v2 = vld [vmem:[%s800_s0] sm:$0xff]  ;;  %v49_v3 = vsel %vm47_vm0, %v34_v1, 0  ;;  %521 = vmatprep.subr.bf16.mxu1 %v621_v0  ;;  %537 = vmatprep.mubr.msk.bf16.mxu1 %vm622_vm1, %v621_v0  ;;  %v585_v7 = vld [vmem:[%s801_s3 + $0x28] sm:$0xff]   ;;  %v587_v9 = vld [vmem:[%s801_s3 + $0x18] sm:$0xff]  }
   0x3   :  { %v36_v4 = vpack.c.bf16 %v33_v2, %v33_v2  ;;  %516 = vmatpush3.bf16.msra.mxu0 %v49_v3  ;;  %522 = vmatpush3.bf16.msra.mxu1 %v583_v5  ;;  %v586_v8 = vld [vmem:[%s801_s3 + $0x20] sm:$0xff]   ;;  %v588_v10 = vld [vmem:[%s801_s3 + $0x10] sm:$0xff]   ;;  %v589_v11 = vld [vmem:[%s801_s3 + $0x8] sm:$0xff]  }
   0x4   :  { %541 = vmatprep.subr.bf16.mxu0 %v621_v0  ;;  %523 = vmatprep.subr.bf16.mxu1 %v621_v0  ;;  %v590_v12 = vld [vmem:[%s801_s3] sm:$0xff]   ;;  %v591_v25 = vld [vmem:[%s803_s5 + $0x38] sm:$0xff]   ;;  %v592_v26 = vld [vmem:[%s803_s5 + $0x30] sm:$0xff]  }
   0x5   :  { %v454_v13 = vld [vmem:[%s802_s2] ss:$0 sm:$0xff]  ;;  %v593_v27 = vld [vmem:[%s803_s5 + $0x28] sm:$0xff]   ;;  %v595_v29 = vld [vmem:[%s803_s5 + $0x18] sm:$0xff]  }
   0x6   :  { %518 = vmatmul.mubr.msk.bf16.vlgmr.msra.gmra.mxu0 %vm43_vm2, %v36_v4  ;;  %v594_v28 = vld [vmem:[%s803_s5 + $0x20] sm:$0xff]   ;;  %v596_v30 = vld [vmem:[%s803_s5 + $0x10] sm:$0xff]   ;;  %v597_v31 = vld [vmem:[%s803_s5 + $0x8] sm:$0xff]  }
   0x7   :  { %557 = vmatprep.mubr.msk.bf16.mxu0 %vm622_vm1, %v621_v0  ;;  %524 = vmatpush3.bf16.msra.mxu1 %v584_v6  ;;  %v598_v32 = vld [vmem:[%s803_s5] sm:$0xff]   ;;  %v599_v45 = vld [vmem:[%s805_s7 + $0x38] sm:$0xff]   ;;  %v600_v46 = vld [vmem:[%s805_s7 + $0x30] sm:$0xff]  }
   0x8   :  { %525 = vmatprep.subr.bf16.mxu1 %v621_v0  ;;  %542 = vmatpush3.bf16.msra.mxu0 %v591_v25  ;;  %v457_v33 = vld [vmem:[%s804_s4] ss:$0 sm:$0xff]  ;;  %v601_v47 = vld [vmem:[%s805_s7 + $0x28] sm:$0xff]   ;;  %v603_v49 = vld [vmem:[%s805_s7 + $0x18] sm:$0xff]  }
   0x9   :  { %543 = vmatprep.subr.bf16.mxu0 %v621_v0  ;;  %v602_v48 = vld [vmem:[%s805_s7 + $0x20] sm:$0xff]   ;;  %v604_v50 = vld [vmem:[%s805_s7 + $0x10] sm:$0xff]   ;;  %v605_v51 = vld [vmem:[%s805_s7 + $0x8] sm:$0xff]  }
   0xa   :  { %v606_v52 = vld [vmem:[%s805_s7] sm:$0xff]  }
   0xb   :  { %526 = vmatpush3.bf16.msra.mxu1 %v585_v7  ;;  %v467_v53 = vld [vmem:[%s806_s6] ss:$0 sm:$0xff] }
   0xc   :  { %527 = vmatprep.subr.bf16.mxu1 %v621_v0  ;;  %544 = vmatpush3.bf16.msra.mxu0 %v592_v26  ;;  %v477_v1 = vld [vmem:[%s807_s8] ss:$0 sm:$0xff] }
   0xd   :  { %545 = vmatprep.subr.bf16.mxu0 %v621_v0 }
   0xf   :  { %528 = vmatpush3.bf16.msra.mxu1 %v586_v8 }
  0x10   :  { %529 = vmatprep.subr.bf16.mxu1 %v621_v0  ;;  %546 = vmatpush3.bf16.msra.mxu0 %v593_v27 }
  0x11   :  { %547 = vmatprep.subr.bf16.mxu0 %v621_v0 }
  0x13   :  { %530 = vmatpush3.bf16.msra.mxu1 %v587_v9 }
  0x14   :  { %531 = vmatprep.subr.bf16.mxu1 %v621_v0  ;;  %548 = vmatpush3.bf16.msra.mxu0 %v594_v28 }
  0x15   :  { %549 = vmatprep.subr.bf16.mxu0 %v621_v0 }
  0x17   :  { %532 = vmatpush3.bf16.msra.mxu1 %v588_v10 }
  0x18   :  { %533 = vmatprep.subr.bf16.mxu1 %v621_v0  ;;  %550 = vmatpush3.bf16.msra.mxu0 %v595_v29 }
  0x19   :  { %551 = vmatprep.subr.bf16.mxu0 %v621_v0 }
  0x1b   :  { %534 = vmatpush3.bf16.msra.mxu1 %v589_v11 }
  0x1c   :  { %535 = vmatprep.subr.bf16.mxu1 %v621_v0  ;;  %552 = vmatpush3.bf16.msra.mxu0 %v596_v30 }
  0x1d   :  { %553 = vmatprep.subr.bf16.mxu0 %v621_v0 }
  0x1f   :  { %536 = vmatpush3.bf16.msra.mxu1 %v590_v12 }
  0x20   :  { %561 = vmatprep.subr.bf16.mxu1 %v621_v0  ;;  %554 = vmatpush3.bf16.msra.mxu0 %v597_v31 }
  0x21   :  { %555 = vmatprep.subr.bf16.mxu0 %v621_v0 }
  0x24   :  { %556 = vmatpush3.bf16.msra.mxu0 %v598_v32 }
  0xc6   :  { %v85_v14 = vpop.f32.mrf.mxu0 }
  0xc7   :  { %v86_v15 = vadd.f32 %v454_v13, %v85_v14 }
  0xc8   :  { %v519_v16 = vpop.f32.mrf.mxu0 }
  0xc9   :  { %v456_v17 = vmul.f32 -1.442695, %v86_v15 }
  0xca   :  { %v88_v18 = vpop.f32.mrf.mxu0 }
  0xcb   :  { %607 = vpow2.f32 %v456_v17 }
  0xcc   :  { %v520_v19 = vpop.f32.mrf.mxu0 }
  0xd8   :  { %v608_v20 = vpop.eup %607 }
  0xd9   :  { %v94_v21 = vadd.f32 1.0, %v608_v20 }
  0xdb   :  { %609 = vrcp.f32 %v94_v21 }
  0xe8   :  { %v610_v22 = vpop.eup %609 }
  0xe9   :  { %v97_v23 = vmul.f32 %v610_v22, %v86_v15 }
  0xeb   :  { %v115_v24 = vpack.c.bf16 %v97_v23, %v97_v23 }
  0xed   :  { %538 = vmatmul.mubr.bf16.vlgmr.msra.gmra.mxu1 %v115_v24 }
  0xee   :  { %577 = vmatprep.mubr.msk.bf16.mxu1 %vm622_vm1, %v621_v0  ;;  %562 = vmatpush3.bf16.msra.mxu1 %v599_v45 }
  0xef   :  { %563 = vmatprep.subr.bf16.mxu1 %v621_v0 }
  0xf2   :  { %564 = vmatpush3.bf16.msra.mxu1 %v600_v46 }
  0xf3   :  { %565 = vmatprep.subr.bf16.mxu1 %v621_v0 }
  0xf6   :  { %566 = vmatpush3.bf16.msra.mxu1 %v601_v47 }
  0xf7   :  { %567 = vmatprep.subr.bf16.mxu1 %v621_v0 }
  0xfa   :  { %568 = vmatpush3.bf16.msra.mxu1 %v602_v48 }
  0xfb   :  { %569 = vmatprep.subr.bf16.mxu1 %v621_v0 }
  0xfe   :  { %570 = vmatpush3.bf16.msra.mxu1 %v603_v49 }
  0xff   :  { %571 = vmatprep.subr.bf16.mxu1 %v621_v0 }
 0x102   :  { %572 = vmatpush3.bf16.msra.mxu1 %v604_v50 }
 0x103   :  { %573 = vmatprep.subr.bf16.mxu1 %v621_v0 }
 0x106   :  { %574 = vmatpush3.bf16.msra.mxu1 %v605_v51 }
 0x107   :  { %575 = vmatprep.subr.bf16.mxu1 %v621_v0 }
 0x10a   :  { %576 = vmatpush3.bf16.msra.mxu1 %v606_v52 }
 0x1ad   :  { %v204_v34 = vpop.f32.mrf.mxu1 }
 0x1ae   :  { %v205_v35 = vadd.f32 %v457_v33, %v204_v34 }
 0x1af   :  { %v539_v36 = vpop.f32.mrf.mxu1 }
 0x1b0   :  { %v466_v37 = vmul.f32 -1.442695, %v205_v35 }
 0x1b1   :  { %v207_v38 = vpop.f32.mrf.mxu1 }
 0x1b2   :  { %611 = vpow2.f32 %v466_v37 }
 0x1b3   :  { %v540_v39 = vpop.f32.mrf.mxu1 }
 0x1bf   :  { %v612_v40 = vpop.eup %611 }
 0x1c0   :  { %v213_v41 = vadd.f32 1.0, %v612_v40 }
 0x1c2   :  { %613 = vrcp.f32 %v213_v41 }
 0x1cf   :  { %v614_v42 = vpop.eup %613 }
 0x1d0   :  { %v216_v43 = vmul.f32 %v614_v42, %v205_v35 }
 0x1d2   :  { %v234_v44 = vpack.c.bf16 %v216_v43, %v216_v43 }
 0x1d4   :  { %558 = vmatmul.mubr.bf16.vlgmr.msra.gmra.mxu0 %v234_v44 }
 0x294   :  { %v323_v54 = vpop.f32.mrf.mxu0 }
 0x295   :  { %v324_v55 = vadd.f32 %v467_v53, %v323_v54 }
 0x296   :  { %v559_v56 = vpop.f32.mrf.mxu0 }
 0x297   :  { %v476_v57 = vmul.f32 -1.442695, %v324_v55 }
 0x298   :  { %v326_v58 = vpop.f32.mrf.mxu0 }
 0x299   :  { %615 = vpow2.f32 %v476_v57 }
 0x29a   :  { %v560_v59 = vpop.f32.mrf.mxu0 }
 0x2a6   :  { %v616_v60 = vpop.eup %615 }
 0x2a7   :  { %v332_v61 = vadd.f32 1.0, %v616_v60 }
 0x2a9   :  { %617 = vrcp.f32 %v332_v61 }
 0x2b6   :  { %v618_v62 = vpop.eup %617 }
 0x2b7   :  { %v335_v63 = vmul.f32 %v618_v62, %v324_v55 }
 0x2b9   :  { %v353_v0 = vpack.c.bf16 %v335_v63, %v335_v63 }
 0x2bb   :  { %578 = vmatmul.mubr.bf16.vlgmr.msra.gmra.mxu1 %v353_v0 }
 0x37b   :  { %v442_v2 = vpop.f32.mrf.mxu1 }
 0x37c   :  { %v443_v3 = vadd.f32 %v477_v1, %v442_v2 }
 0x37d   :  { %v579_v4 = vpop.f32.mrf.mxu1 }
 0x37e   :  { %619 = vtanh.f32 %v443_v3 }
 0x37f   :  { %v445_v5 = vpop.f32.mrf.mxu1 }
 0x381   :  { %v580_v6 = vpop.f32.mrf.mxu1 }
 0x38b   :  { %v620_v7 = vpop.eup %619 }
 0x38c   :  { %449 = vst [vmem:[%s808_s9] sm:$0xff] %v620_v7 }

// kernel: _mlp_forward_impl.1
= control target key start
LH: loop header
LB: loop body
LE: loop exit
PB: predicated region body
PF: predicated region fallthrough
CT: control target
= control target key end

     0   :  { %vm47_vm0 = vcmask 1041408   ;;  %v621_v0 = vmov 0.0   ;;  %vm622_vm1 = vmmov 0   ;;  %vm43_vm2 = vcmask 31744   ;;  %s799_s1 = inlined_call_operand.vmem [shape: bf16[4,128], index: 1, kind: input, shape index: {}]   ;;  %s800_s0 = inlined_call_operand.vmem [shape: f32[8,4], index: 0, kind: input, shape index: {}]   ;;  %s801_s3 = inlined_call_operand.vmem [shape: bf16[128,128], index: 3, kind: input, shape index: {}]   ;;  %s802_s2 = inlined_call_operand.vmem [shape: f32[1,128], index: 2, kind: input, shape index: {}]   ;;  %s803_s5 = inlined_call_operand.vmem [shape: bf16[128,128], index: 5, kind: input, shape index: {}]   ;;  %s804_s4 = inlined_call_operand.vmem [shape: f32[1,128], index: 4, kind: input, shape index: {}]   ;;  %s805_s7 = inlined_call_operand.vmem [shape: bf16[128,128], index: 7, kind: input, shape index: {}]   ;;  %s806_s6 = inlined_call_operand.vmem [shape: f32[1,128], index: 6, kind: input, shape index: {}]   ;;  %s807_s8 = inlined_call_operand.vmem [shape: f32[1,128], index: 8, kind: input, shape index: {}]   ;;  %s808_s9 = inlined_call_operand.vmem [shape: f32[8,128], index: 9, kind: output, shape index: {}]  }
   0x1   :  { %515 = vmatprep.subr.bf16.mxu0 %v621_v0  ;;  %v34_v1 = vld [vmem:[%s799_s1] sm:$0x3]  ;;  %517 = vmatprep.mubr.msk.bf16.mxu0 %vm622_vm1, %v621_v0  ;;  %v583_v5 = vld [vmem:[%s801_s3 + $0x38] sm:$0xff]   ;;  %v584_v6 = vld [vmem:[%s801_s3 + $0x30] sm:$0xff]  }
   0x2   :  { %v33_v2 = vld [vmem:[%s800_s0] sm:$0xff]  ;;  %v49_v3 = vsel %vm47_vm0, %v34_v1, 0  ;;  %521 = vmatprep.subr.bf16.mxu1 %v621_v0  ;;  %537 = vmatprep.mubr.msk.bf16.mxu1 %vm622_vm1, %v621_v0  ;;  %v585_v7 = vld [vmem:[%s801_s3 + $0x28] sm:$0xff]   ;;  %v587_v9 = vld [vmem:[%s801_s3 + $0x18] sm:$0xff]  }
   0x3   :  { %v36_v4 = vpack.c.bf16 %v33_v2, %v33_v2  ;;  %516 = vmatpush3.bf16.msra.mxu0 %v49_v3  ;;  %522 = vmatpush3.bf16.msra.mxu1 %v583_v5  ;;  %v586_v8 = vld [vmem:[%s801_s3 + $0x20] sm:$0xff]   ;;  %v588_v10 = vld [vmem:[%s801_s3 + $0x10] sm:$0xff]   ;;  %v589_v11 = vld [vmem:[%s801_s3 + $0x8] sm:$0xff]  }
   0x4   :  { %541 = vmatprep.subr.bf16.mxu0 %v621_v0  ;;  %523 = vmatprep.subr.bf16.mxu1 %v621_v0  ;;  %v590_v12 = vld [vmem:[%s801_s3] sm:$0xff]   ;;  %v591_v25 = vld [vmem:[%s803_s5 + $0x38] sm:$0xff]   ;;  %v592_v26 = vld [vmem:[%s803_s5 + $0x30] sm:$0xff]  }
   0x5   :  { %v454_v13 = vld [vmem:[%s802_s2] ss:$0 sm:$0xff]  ;;  %v593_v27 = vld [vmem:[%s803_s5 + $0x28] sm:$0xff]   ;;  %v595_v29 = vld [vmem:[%s803_s5 + $0x18] sm:$0xff]  }
   0x6   :  { %518 = vmatmul.mubr.msk.bf16.vlgmr.msra.gmra.mxu0 %vm43_vm2, %v36_v4  ;;  %v594_v28 = vld [vmem:[%s803_s5 + $0x20] sm:$0xff]   ;;  %v596_v30 = vld [vmem:[%s803_s5 + $0x10] sm:$0xff]   ;;  %v597_v31 = vld [vmem:[%s803_s5 + $0x8] sm:$0xff]  }
   0x7   :  { %557 = vmatprep.mubr.msk.bf16.mxu0 %vm622_vm1, %v621_v0  ;;  %524 = vmatpush3.bf16.msra.mxu1 %v584_v6  ;;  %v598_v32 = vld [vmem:[%s803_s5] sm:$0xff]   ;;  %v599_v45 = vld [vmem:[%s805_s7 + $0x38] sm:$0xff]   ;;  %v600_v46 = vld [vmem:[%s805_s7 + $0x30] sm:$0xff]  }
   0x8   :  { %525 = vmatprep.subr.bf16.mxu1 %v621_v0  ;;  %542 = vmatpush3.bf16.msra.mxu0 %v591_v25  ;;  %v457_v33 = vld [vmem:[%s804_s4] ss:$0 sm:$0xff]  ;;  %v601_v47 = vld [vmem:[%s805_s7 + $0x28] sm:$0xff]   ;;  %v603_v49 = vld [vmem:[%s805_s7 + $0x18] sm:$0xff]  }
   0x9   :  { %543 = vmatprep.subr.bf16.mxu0 %v621_v0  ;;  %v602_v48 = vld [vmem:[%s805_s7 + $0x20] sm:$0xff]   ;;  %v604_v50 = vld [vmem:[%s805_s7 + $0x10] sm:$0xff]   ;;  %v605_v51 = vld [vmem:[%s805_s7 + $0x8] sm:$0xff]  }
   0xa   :  { %v606_v52 = vld [vmem:[%s805_s7] sm:$0xff]  }
   0xb   :  { %526 = vmatpush3.bf16.msra.mxu1 %v585_v7  ;;  %v467_v53 = vld [vmem:[%s806_s6] ss:$0 sm:$0xff] }
   0xc   :  { %527 = vmatprep.subr.bf16.mxu1 %v621_v0  ;;  %544 = vmatpush3.bf16.msra.mxu0 %v592_v26  ;;  %v477_v1 = vld [vmem:[%s807_s8] ss:$0 sm:$0xff] }
   0xd   :  { %545 = vmatprep.subr.bf16.mxu0 %v621_v0 }
   0xf   :  { %528 = vmatpush3.bf16.msra.mxu1 %v586_v8 }
  0x10   :  { %529 = vmatprep.subr.bf16.mxu1 %v621_v0  ;;  %546 = vmatpush3.bf16.msra.mxu0 %v593_v27 }
  0x11   :  { %547 = vmatprep.subr.bf16.mxu0 %v621_v0 }
  0x13   :  { %530 = vmatpush3.bf16.msra.mxu1 %v587_v9 }
  0x14   :  { %531 = vmatprep.subr.bf16.mxu1 %v621_v0  ;;  %548 = vmatpush3.bf16.msra.mxu0 %v594_v28 }
  0x15   :  { %549 = vmatprep.subr.bf16.mxu0 %v621_v0 }
  0x17   :  { %532 = vmatpush3.bf16.msra.mxu1 %v588_v10 }
  0x18   :  { %533 = vmatprep.subr.bf16.mxu1 %v621_v0  ;;  %550 = vmatpush3.bf16.msra.mxu0 %v595_v29 }
  0x19   :  { %551 = vmatprep.subr.bf16.mxu0 %v621_v0 }
  0x1b   :  { %534 = vmatpush3.bf16.msra.mxu1 %v589_v11 }
  0x1c   :  { %535 = vmatprep.subr.bf16.mxu1 %v621_v0  ;;  %552 = vmatpush3.bf16.msra.mxu0 %v596_v30 }
  0x1d   :  { %553 = vmatprep.subr.bf16.mxu0 %v621_v0 }
  0x1f   :  { %536 = vmatpush3.bf16.msra.mxu1 %v590_v12 }
  0x20   :  { %561 = vmatprep.subr.bf16.mxu1 %v621_v0  ;;  %554 = vmatpush3.bf16.msra.mxu0 %v597_v31 }
  0x21   :  { %555 = vmatprep.subr.bf16.mxu0 %v621_v0 }
  0x24   :  { %556 = vmatpush3.bf16.msra.mxu0 %v598_v32 }
  0xc6   :  { %v85_v14 = vpop.f32.mrf.mxu0 }
  0xc7   :  { %v86_v15 = vadd.f32 %v454_v13, %v85_v14 }
  0xc8   :  { %v519_v16 = vpop.f32.mrf.mxu0 }
  0xc9   :  { %v456_v17 = vmul.f32 -1.442695, %v86_v15 }
  0xca   :  { %v88_v18 = vpop.f32.mrf.mxu0 }
  0xcb   :  { %607 = vpow2.f32 %v456_v17 }
  0xcc   :  { %v520_v19 = vpop.f32.mrf.mxu0 }
  0xd8   :  { %v608_v20 = vpop.eup %607 }
  0xd9   :  { %v94_v21 = vadd.f32 1.0, %v608_v20 }
  0xdb   :  { %609 = vrcp.f32 %v94_v21 }
  0xe8   :  { %v610_v22 = vpop.eup %609 }
  0xe9   :  { %v97_v23 = vmul.f32 %v610_v22, %v86_v15 }
  0xeb   :  { %v115_v24 = vpack.c.bf16 %v97_v23, %v97_v23 }
  0xed   :  { %538 = vmatmul.mubr.bf16.vlgmr.msra.gmra.mxu1 %v115_v24 }
  0xee   :  { %577 = vmatprep.mubr.msk.bf16.mxu1 %vm622_vm1, %v621_v0  ;;  %562 = vmatpush3.bf16.msra.mxu1 %v599_v45 }
  0xef   :  { %563 = vmatprep.subr.bf16.mxu1 %v621_v0 }
  0xf2   :  { %564 = vmatpush3.bf16.msra.mxu1 %v600_v46 }
  0xf3   :  { %565 = vmatprep.subr.bf16.mxu1 %v621_v0 }
  0xf6   :  { %566 = vmatpush3.bf16.msra.mxu1 %v601_v47 }
  0xf7   :  { %567 = vmatprep.subr.bf16.mxu1 %v621_v0 }
  0xfa   :  { %568 = vmatpush3.bf16.msra.mxu1 %v602_v48 }
  0xfb   :  { %569 = vmatprep.subr.bf16.mxu1 %v621_v0 }
  0xfe   :  { %570 = vmatpush3.bf16.msra.mxu1 %v603_v49 }
  0xff   :  { %571 = vmatprep.subr.bf16.mxu1 %v621_v0 }
 0x102   :  { %572 = vmatpush3.bf16.msra.mxu1 %v604_v50 }
 0x103   :  { %573 = vmatprep.subr.bf16.mxu1 %v621_v0 }
 0x106   :  { %574 = vmatpush3.bf16.msra.mxu1 %v605_v51 }
 0x107   :  { %575 = vmatprep.subr.bf16.mxu1 %v621_v0 }
 0x10a   :  { %576 = vmatpush3.bf16.msra.mxu1 %v606_v52 }
 0x1ad   :  { %v204_v34 = vpop.f32.mrf.mxu1 }
 0x1ae   :  { %v205_v35 = vadd.f32 %v457_v33, %v204_v34 }
 0x1af   :  { %v539_v36 = vpop.f32.mrf.mxu1 }
 0x1b0   :  { %v466_v37 = vmul.f32 -1.442695, %v205_v35 }
 0x1b1   :  { %v207_v38 = vpop.f32.mrf.mxu1 }
 0x1b2   :  { %611 = vpow2.f32 %v466_v37 }
 0x1b3   :  { %v540_v39 = vpop.f32.mrf.mxu1 }
 0x1bf   :  { %v612_v40 = vpop.eup %611 }
 0x1c0   :  { %v213_v41 = vadd.f32 1.0, %v612_v40 }
 0x1c2   :  { %613 = vrcp.f32 %v213_v41 }
 0x1cf   :  { %v614_v42 = vpop.eup %613 }
 0x1d0   :  { %v216_v43 = vmul.f32 %v614_v42, %v205_v35 }
 0x1d2   :  { %v234_v44 = vpack.c.bf16 %v216_v43, %v216_v43 }
 0x1d4   :  { %558 = vmatmul.mubr.bf16.vlgmr.msra.gmra.mxu0 %v234_v44 }
 0x294   :  { %v323_v54 = vpop.f32.mrf.mxu0 }
 0x295   :  { %v324_v55 = vadd.f32 %v467_v53, %v323_v54 }
 0x296   :  { %v559_v56 = vpop.f32.mrf.mxu0 }
 0x297   :  { %v476_v57 = vmul.f32 -1.442695, %v324_v55 }
 0x298   :  { %v326_v58 = vpop.f32.mrf.mxu0 }
 0x299   :  { %615 = vpow2.f32 %v476_v57 }
 0x29a   :  { %v560_v59 = vpop.f32.mrf.mxu0 }
 0x2a6   :  { %v616_v60 = vpop.eup %615 }
 0x2a7   :  { %v332_v61 = vadd.f32 1.0, %v616_v60 }
 0x2a9   :  { %617 = vrcp.f32 %v332_v61 }
 0x2b6   :  { %v618_v62 = vpop.eup %617 }
 0x2b7   :  { %v335_v63 = vmul.f32 %v618_v62, %v324_v55 }
 0x2b9   :  { %v353_v0 = vpack.c.bf16 %v335_v63, %v335_v63 }
 0x2bb   :  { %578 = vmatmul.mubr.bf16.vlgmr.msra.gmra.mxu1 %v353_v0 }
 0x37b   :  { %v442_v2 = vpop.f32.mrf.mxu1 }
 0x37c   :  { %v443_v3 = vadd.f32 %v477_v1, %v442_v2 }
 0x37d   :  { %v579_v4 = vpop.f32.mrf.mxu1 }
 0x37e   :  { %619 = vtanh.f32 %v443_v3 }
 0x37f   :  { %v445_v5 = vpop.f32.mrf.mxu1 }
 0x381   :  { %v580_v6 = vpop.f32.mrf.mxu1 }
 0x38b   :  { %v620_v7 = vpop.eup %619 }
 0x38c   :  { %449 = vst [vmem:[%s808_s9] sm:$0xff] %v620_v7 }

</bundles_post_ra>
